<compile_context>
chip_gen: v7x
topology: tpu7x:2x2x1
jax: 0.10.0
libtpu: 0.0.40
codegen_flags: <defaults>
</compile_context>

<pallas_src>
import jax
import jax.numpy as jnp
from jax.experimental import pallas as pl
from jax.experimental.pallas import tpu as pltpu

OUTPUT_DIM = 32   # self.output_dim = 0 in the abstract base is degenerate; use 32
LANES = 128


def _round_up(n: int, m: int) -> int:
    return ((n + m - 1) // m) * m


def encoder_kernel(x_ref, w_ref, b_ref, o_ref):
    # x_ref: (tm, FOLD)     -- FOLD folded frames per row (FOLD = 128 // D)
    # w_ref: (FOLD, FOLD*D) -- block-diagonal weight (w on the FOLD 1xD blocks)
    # b_ref: (1, FOLD*D)    -- bias tiled FOLD times
    # o_ref: (tm, FOLD*D)   -- lane-dense output (FOLD*D == 128)
    # Single tiny-K MXU matmul; only +bias / ReLU remain on the VPU.
    acc = jnp.dot(x_ref[...], w_ref[...], preferred_element_type=jnp.float32)
    o_ref[...] = jnp.maximum(acc + b_ref[...], 0.0).astype(o_ref.dtype)


def _prepare_projection(w, b, fold):
    """Build block-diagonal weight / tiled bias.

    For repeated calls with fixed weights, call this once and reuse (or wrap
    the whole forward in jit so it is hoisted)."""
    w2d = w.reshape(1, -1).astype(jnp.float32)
    b2d = b.reshape(1, -1).astype(jnp.float32)
    w_blk = jnp.kron(jnp.eye(fold, dtype=jnp.float32), w2d)   # (fold, fold*D)
    b_tile = jnp.tile(b2d, (1, fold))                         # (1, fold*D)
    return w_blk, b_tile


def _choose_tile_rows(R: int, target: int) -> int:
    if R <= 8:
        # Full-extent single block (block dims == array dims, always legal).
        return max(R, 1)
    # Rows multiple of 8; cap so the grid has >= 2 steps (v7x megacore).
    two_steps = _round_up(pl.cdiv(R, 2), 8)
    return min(_round_up(max(target, 8), 8), two_steps)


def encoder_forward(x, x_lens, w, b, *, tile_rows: int = 8192,
                    out_dtype=jnp.float32):
    """Concrete EncoderInterface.forward.

    Args:
        x:      (batch, time) or (batch, time, 1) float32
        x_lens: (batch,) int32
        w:      (OUTPUT_DIM,) or (1, OUTPUT_DIM) float32 projection weight
        b:      (OUTPUT_DIM,) or (1, OUTPUT_DIM) float32 bias
    Returns:
        output:      (batch, time, OUTPUT_DIM) out_dtype
        output_lens: (batch,) int32  (== x_lens; no temporal subsampling)

    Note: frames beyond x_lens[b] are still computed (same as the pure-JAX
    reference); downstream consumers must mask with output_lens.
    """
    if x.ndim == 3:                 # (batch, time, 1) -> (batch, time)
        x = x[..., 0]
    B, T = x.shape
    D = w.shape[-1]

    # Fold FOLD frames per output row so stores are 128 lanes wide.
    FOLD = LANES // D if (0 < D < LANES and LANES % D == 0) else 1
    DW = FOLD * D

    N = B * T
    R = pl.cdiv(N, FOLD)            # folded rows (NOT padded to a tile multiple)
    N_pad = R * FOLD                # == N whenever (B*T) % FOLD == 0

    x_flat = x.reshape(-1).astype(jnp.float32)
    if N_pad > N:
        x_flat = jnp.pad(x_flat, (0, N_pad - N))
    x_fold = x_flat.reshape(R, FOLD)            # free row-major reshape

    w_blk, b_tile = _prepare_projection(w, b, FOLD)

    tm = _choose_tile_rows(R, tile_rows)
    grid = (pl.cdiv(R, tm),)

    # VMEM budget: x block lane-padded to 128 lanes (~512 B/row) + output block
    # (~512 B/row), double-buffered.  Raise the scoped limit accordingly.
    est_vmem = 2 * tm * 4 * (LANES + max(DW, LANES)) + (1 << 20)
    vmem_limit = int(min(max(est_vmem, 16 << 20), 64 << 20))

    out_fold = pl.pallas_call(
        encoder_kernel,
        out_shape=jax.ShapeDtypeStruct((R, DW), out_dtype),
        grid=grid,
        in_specs=[
            pl.BlockSpec((tm, FOLD), lambda i: (i, 0)),
            pl.BlockSpec((FOLD, DW), lambda i: (0, 0)),
            pl.BlockSpec((1, DW), lambda i: (0, 0)),
        ],
        out_specs=pl.BlockSpec((tm, DW), lambda i: (i, 0)),
        compiler_params=pltpu.CompilerParams(
            dimension_semantics=("parallel",),
            vmem_limit_bytes=vmem_limit),
    )(x_fold, w_blk, b_tile)

    # (R, FOLD*D) row-major == (N_pad, D) row-major: unfold for free.
    if N_pad == N:
        output = out_fold.reshape(B, T, D)      # no epilogue copy
    else:
        # Only when (B*T) % FOLD != 0: pay one small slice (<= FOLD-1 rows pad).
        output = out_fold.reshape(N_pad, D)[:N].reshape(B, T, D)

    output_lens = x_lens            # no temporal subsampling
    return output, output_lens


# TODO(synk): streaming_forward() and get_init_state() are abstract
# (NotImplementedError) in the reference module; no concrete semantics to port.


def _reference(x, w, b):
    if x.ndim == 3:
        x = x[..., 0]
    return jnp.maximum(x[..., None] * w[None, None, :] + b[None, None, :], 0.0)


if __name__ == "__main__":
    key = jax.random.PRNGKey(0)
    k_x, k_w, k_b, k_x2 = jax.random.split(key, 4)

    # Deterministic synthetic parameters (1 scalar feature/frame -> OUTPUT_DIM).
    w = jax.random.normal(k_w, (OUTPUT_DIM,), dtype=jnp.float32) * 0.1
    b = jax.random.normal(k_b, (OUTPUT_DIM,), dtype=jnp.float32) * 0.01

    # Case 1: small shape from the interface contract (single full-extent block).
    B, T = 2, 8
    x = jax.random.normal(k_x, (B, T), dtype=jnp.float32)
    x_lens = jnp.array([T, T - 2], dtype=jnp.int32)
    out, out_lens = encoder_forward(x, x_lens, w, b)
    jax.block_until_ready((out, out_lens))
    ref = _reference(x, w, b)
    assert out.shape == (B, T, OUTPUT_DIM)
    assert out_lens.shape == (B,)
    assert jnp.allclose(out, ref, atol=1e-5, rtol=1e-5)

    # Case 2: exercises the multi-step grid and clamped partial final block.
    B2, T2 = 3, 50
    x2 = jax.random.normal(k_x2, (B2, T2), dtype=jnp.float32)
    x2_lens = jnp.array([T2, T2 - 5, T2 - 11], dtype=jnp.int32)
    out2, out2_lens = encoder_forward(x2, x2_lens, w, b, tile_rows=8192)
    jax.block_until_ready((out2, out2_lens))
    ref2 = _reference(x2, w, b)
    assert out2.shape == (B2, T2, OUTPUT_DIM)
    assert jnp.allclose(out2, ref2, atol=1e-5, rtol=1e-5)
    assert jnp.array_equal(out2_lens, x2_lens)

    print("KERNEL_OK")
</pallas_src>

<mosaic_0001>
module attributes {stable_mosaic.version = 11 : i64} {
  func.func @encoder_kernel(%arg0: i32, %arg1: memref<4x4xf32, #tpu.memory_space<vmem>>, %arg2: memref<4x128xf32, #tpu.memory_space<vmem>>, %arg3: memref<1x128xf32, #tpu.memory_space<vmem>>, %arg4: memref<4x128xf32, #tpu.memory_space<vmem>>) attributes {dimension_semantics = [#tpu.dimension_semantics<parallel>], iteration_bounds = array<i64: 1>, scalar_prefetch = 0 : i64, scratch_operands = 0 : i64, tpu.core_type = #tpu.core_type<tc>, window_params = [{transform_indices = @transform_0, window_bounds = array<i64: 4, 4>}, {pipeline_mode = #tpu.pipeline_mode<synchronous>, transform_indices = @transform_1, window_bounds = array<i64: 4, 128>}, {pipeline_mode = #tpu.pipeline_mode<synchronous>, transform_indices = @transform_2, window_bounds = array<i64: 1, 128>}, {transform_indices = @transform_3, window_bounds = array<i64: 4, 128>}]} {
    %c0 = arith.constant 0 : index
    %c0_0 = arith.constant 0 : index
    %0 = vector.load %arg1[%c0, %c0_0] : memref<4x4xf32, #tpu.memory_space<vmem>>, vector<4x4xf32>
    %c0_1 = arith.constant 0 : index
    %c0_2 = arith.constant 0 : index
    %1 = vector.load %arg2[%c0_1, %c0_2] : memref<4x128xf32, #tpu.memory_space<vmem>>, vector<4x128xf32>
    %cst = arith.constant dense<0.000000e+00> : vector<4x128xf32>
    %2 = tpu.matmul %0, %1, %cst {dimension_numbers = #tpu.dot_dimension_numbers<[1], [0], [0], [1], [0, 0, 1, 1], [], []>} : vector<4x4xf32>, vector<4x128xf32>, vector<4x128xf32> -> vector<4x128xf32>
    %c0_3 = arith.constant 0 : index
    %c0_4 = arith.constant 0 : index
    %3 = vector.load %arg3[%c0_3, %c0_4] : memref<1x128xf32, #tpu.memory_space<vmem>>, vector<1x128xf32>
    %4 = vector.broadcast %3 : vector<1x128xf32> to vector<4x128xf32>
    %5 = arith.addf %2, %4 : vector<4x128xf32>
    %cst_5 = arith.constant 0.000000e+00 : f32
    %6 = vector.broadcast %cst_5 : f32 to vector<4x128xf32>
    %7 = arith.maximumf %5, %6 : vector<4x128xf32>
    %c0_6 = arith.constant 0 : index
    %c0_7 = arith.constant 0 : index
    %8 = vector.load %arg4[%c0_6, %c0_7] : memref<4x128xf32, #tpu.memory_space<vmem>>, vector<4x128xf32>
    tpu.vector_store %arg4[%c0_6, %c0_7], %7 {strides = array<i32>} : memref<4x128xf32, #tpu.memory_space<vmem>>, vector<4x128xf32>,
    return
  }
  func.func @transform_0(%arg0: i32) -> (i32, i32) {
    %c0_i32 = arith.constant 0 : i32
    %c0_i32_0 = arith.constant 0 : i32
    return %arg0, %c0_i32 : i32, i32
  }
  func.func @transform_1(%arg0: i32) -> (i32, i32) {
    %c0_i32 = arith.constant 0 : i32
    %c0_i32_0 = arith.constant 0 : i32
    %c0_i32_1 = arith.constant 0 : i32
    return %c0_i32, %c0_i32_0 : i32, i32
  }
  func.func @transform_2(%arg0: i32) -> (i32, i32) {
    %c0_i32 = arith.constant 0 : i32
    %c0_i32_0 = arith.constant 0 : i32
    %c0_i32_1 = arith.constant 0 : i32
    return %c0_i32, %c0_i32_0 : i32, i32
  }
  func.func @transform_3(%arg0: i32) -> (i32, i32) {
    %c0_i32 = arith.constant 0 : i32
    %c0_i32_0 = arith.constant 0 : i32
    return %arg0, %c0_i32 : i32, i32
  }
}

</mosaic_0001>

<bundles_post_ra>
// kernel: tpu_custom_call.1
= control target key start
LH: loop header
LB: loop body
LE: loop exit
PB: predicated region body
PF: predicated region fallthrough
CT: control target
= control target key end

     0   :  { %8 = vsyncpa [#allocation3], 0  ;;  %s295_s0 = inlined_call_operand.hbm [shape: f32[4,4], index: 0, kind: input, shape index: {}]   ;;  %s296_s1 = inlined_call_operand.hbm [shape: f32[4,128], index: 1, kind: input, shape index: {}]   ;;  %s297_s2 = inlined_call_operand.vmem [shape: f32[1,128], index: 2, kind: input, shape index: {}]   ;;  %s298_s3 = inlined_call_operand.hbm [shape: f32[4,128], index: 3, kind: output, shape index: {}]  }
   0x1   :  { %9 = vsyncpa [#allocation6], 0 }
   0x2   :  { %10 = vsyncpa [#allocation4], 0  ;;  %s231_s12 = smov [#allocation2]   ;;  %s232_s14 = smov [#allocation5]  }
   0x3   :  { %s17_s13 = sshll.u32 %s231_s12, 4  ;;  %s27_s15 = sshll.u32 %s232_s14, 4  ;;  %s18_s13 = int_to_ptr.vmem [resolvable:$true] %s17_s13  ;;  %s28_s15 = int_to_ptr.vmem [resolvable:$true] %s27_s15 }
   0x4   :  { %s159_s18 = scalar_lea.hbm %s295_s0, 64 }
   0x5   :  { %p160_p0 = scmp.ne.s32.totalorder %s295_s0, %s159_s18  ;;  %p163_p1 = scmp.lt.u32.totalorder %s159_s18, %s295_s0 }
   0x7   :  { %p165_p2 = pnand %p163_p1, %p160_p0 }
   0x9   :  { %168 = shalt.err (!%p165_p2)
}
   0xa   :  { %s169_s23 = scalar_lea.vmem %s18_s13, 64  ;;  %p174_p4 = scmp.lt.s32.totalorder %s18_s13, %s18_s13 }
   0xb   :  { %p170_p3 = scmp.ne.s32.totalorder %s18_s13, %s169_s23  ;;  %p175_p5 = scmp.lt.s32.totalorder %s169_s23, %s169_s23 }
   0xd   :  { %p176_p6 = por %p175_p5, %p174_p4 }
   0xf   :  { %p177_p7 = pnand %p176_p6, %p170_p3 }
  0x11   :  { %180 = shalt.err (!%p177_p7)
}
  0x12   :  { %20 = dma.hbm_to_vmem [thread:$0]  %s295_s0, 64, %s18_s13, [#allocation3]  }
  0x13   :  { %s181_s28 = scalar_lea.hbm %s296_s1, 64 }
  0x14   :  { %p182_p8 = scmp.ne.s32.totalorder %s296_s1, %s181_s28  ;;  %p185_p9 = scmp.lt.u32.totalorder %s181_s28, %s296_s1 }
  0x16   :  { %p187_p10 = pnand %p185_p9, %p182_p8 }
  0x18   :  { %190 = shalt.err (!%p187_p10)
}
  0x19   :  { %s191_s6 = scalar_lea.vmem %s28_s15, 64  ;;  %p196_p12 = scmp.lt.s32.totalorder %s28_s15, %s28_s15 }
  0x1a   :  { %p192_p11 = scmp.ne.s32.totalorder %s28_s15, %s191_s6  ;;  %p197_p13 = scmp.lt.s32.totalorder %s191_s6, %s191_s6 }
  0x1c   :  { %p198_p0 = por %p197_p13, %p196_p12 }
  0x1e   :  { %p199_p1 = pnand %p198_p0, %p192_p11 }
  0x20   :  { %202 = shalt.err (!%p199_p1)
}
  0x21   :  { %30 = dma.hbm_to_vmem [thread:$0]  %s296_s1, 64, %s28_s15, [#allocation6]  }
  0x22   :  { %225 = dma.done.wait [#allocation3], 64  }
  0x23   :  { %226 = vsyncadd [#allocation3], 4294967232 }
  0x24   :  { %227 = dma.done.wait [#allocation6], 64  }
  0x25   :  { %228 = vsyncadd [#allocation6], 4294967232  ;;  %v233_v0 = vmov 0.0   ;;  %vm234_vm0 = vmmov 0   ;;  %vm52_vm1 = vcmask 1043456   ;;  %vm48_vm2 = vcmask 31744  }
  0x26   :  { %149 = vmatprep.subr.mxu0 %v233_v0  ;;  %151 = vmatprep.mubr.msk.f32.mxu0 %vm234_vm0, %v233_v0  ;;  %v40_v1 = vld [vmem:[#allocation5] sm:$0xf]  ;;  %v39_v2 = vld [vmem:[#allocation2] sm:$0xf]  ;;  %s235_s1 = smov [#allocation7]  }
  0x27   :  { %150 = vmatpush3.msk.msra.mxu0 %vm52_vm1, %v40_v1  ;;  %v144_v3 = vld [vmem:[%s297_s2] ss:$0 sm:$0xff]  ;;  %s134_s10 = sshll.u32 %s235_s1, 4  ;;  %s135_s10 = int_to_ptr.vmem [resolvable:$true] %s134_s10 }
  0x28   :  { %152 = vmatmul.mubr.msk.f32.vlgmr.msra.gmra.mrb[0].mxu0 %vm48_vm2, %v39_v2  ;;  %s203_s11 = scalar_lea.vmem %s135_s10, 64  ;;  %p208_p3 = scmp.lt.s32.totalorder %s135_s10, %s135_s10 }
  0x29   :  { %p204_p2 = scmp.ne.s32.totalorder %s135_s10, %s203_s11  ;;  %p209_p4 = scmp.lt.s32.totalorder %s203_s11, %s203_s11 }
  0x2b   :  { %p210_p5 = por %p209_p4, %p208_p3 }
  0x2d   :  { %p211_p6 = pnand %p210_p5, %p204_p2 }
  0xfb   :  { %v122_v4 = vpop.f32.mrb[0].mxu0 }
  0xfc   :  { %v123_v5 = vadd.f32 %v144_v3, %v122_v4  ;;  %v153_v6 = vpop.f32.mrb[1].mxu0 }
  0xfe   :  { %v126_v7 = vmax.f32 %v123_v5, 0.0 }
 0x100   :  { %127 = vst [vmem:[#allocation7] sm:$0xf] %v126_v7 }
 0x101   :  { %214 = shalt.err (!%p211_p6)
}
 0x102   :  { %s215_s14 = scalar_lea.hbm %s298_s3, 64 }
 0x103   :  { %p216_p7 = scmp.ne.s32.totalorder %s298_s3, %s215_s14  ;;  %p219_p8 = scmp.lt.u32.totalorder %s215_s14, %s298_s3 }
 0x105   :  { %p221_p9 = pnand %p219_p8, %p216_p7 }
 0x107   :  { %224 = shalt.err (!%p221_p9)
}
 0x108   :  { %137 = dma.vmem_to_hbm [thread:$0]  %s135_s10, 64, %s298_s3, [#allocation4]  }
 0x109   :  { %229 = dma.done.wait [#allocation4], 64  }
 0x10a   :  { %230 = vsyncadd [#allocation4], 4294967232 }
 0x10b   :  { %141 = vsyncpa [#allocation3], 1 }
 0x10c   :  { %142 = vsyncpa [#allocation6], 1 }
 0x10d   :  { %143 = vsyncpa [#allocation4], 1 }

</bundles_post_ra>
